<compile_context>
chip_gen: v5e
topology: v5e:2x2
jax: 0.10.0
libtpu: 0.0.40
codegen_flags: <defaults>
</compile_context>

<pallas_src>
import functools

import jax
import jax.numpy as jnp
from jax.experimental import pallas as pl
from jax.experimental.pallas import tpu as pltpu

_LANE = 128      # vreg lane width  -> last-dim alignment
_SUBLANE = 8     # vreg sublane count -> second-to-last-dim alignment


def _round_up(x, m):
    return ((x + m - 1) // m) * m


def _num_tensorcores():
    """2 TensorCores per chip on v7x, 1 on v5e/v6e. Best-effort query."""
    try:
        kind = jax.devices()[0].device_kind.lower()
    except Exception:
        return 1
    return 2 if ("v7" in kind or "7x" in kind) else 1


def _mlp_kernel(n_layers, *refs):
    """Fused MLP forward on one (TB, obs) batch tile.

    refs = (x_ref, w0_ref, b0_ref, ..., wL_ref, bL_ref, out_ref).
    Weights/biases map to block (0, 0) for every grid step -> VMEM-resident
    across batch tiles (DMA'd once); only the activation tile moves.
    """
    x_ref = refs[0]
    out_ref = refs[-1]
    wb = refs[1:-1]

    x = x_ref[...]
    for i in range(n_layers):
        w = wb[2 * i][...]          # (in_p, out_p)  -- fed to MXU in native dtype
        b = wb[2 * i + 1][...]      # (1, out_p)
        x = jnp.dot(x, w, preferred_element_type=jnp.float32) + b
        if i < n_layers - 1:        # ReLU on hidden layers only
            x = jnp.maximum(x, 0.0)
    out_ref[...] = x.astype(out_ref.dtype)


def pad_dqn_params(params):
    """One-time padding of params to lane-dense shapes (call once at init).

    Only output (N) dims are padded to multiples of 128; the first layer's K dim
    stays at obs_space (full-array block is legal and avoids inflating the input).
    Zero padding is exact: padded output lanes get zero weight columns and zero bias,
    so they stay 0 through ReLU and hit zero weight rows in the next layer.
    """
    obs = params[0][0].shape[0]
    dims = [obs] + [w.shape[1] for w, _ in params]
    dims_p = [obs] + [_round_up(d, _LANE) for d in dims[1:]]
    padded = []
    for i, (w, b) in enumerate(params):
        in_p, out_p = dims_p[i], dims_p[i + 1]
        w_p = jnp.zeros((in_p, out_p), w.dtype).at[: w.shape[0], : w.shape[1]].set(w)
        b_p = jnp.zeros((1, out_p), b.dtype).at[:, : b.shape[1]].set(b)
        padded.append((w_p, b_p))
    return tuple(padded)


@functools.partial(jax.jit, static_argnames=("out_dim", "max_batch_tile", "num_cores"))
def dqn_forward(state, padded_params, *, out_dim, max_batch_tile=512, num_cores=1):
    """state: (B, obs) f32; padded_params: output of pad_dqn_params.

    Whole forward is one jitted dispatch: pad batch -> fused Pallas MLP -> slice.
    """
    n_layers = len(padded_params)
    batch, obs = state.shape
    dims_p = [obs] + [w.shape[1] for w, _ in padded_params]

    # --- batch tiling: grid of 1 on single-TC chips, even grid across v7x's 2 TCs ---
    batch_p8 = _round_up(batch, _SUBLANE)
    tb = min(max_batch_tile, _round_up(pl.cdiv(batch_p8, num_cores), _SUBLANE))
    batch_p = _round_up(batch_p8, tb)
    if batch_p == batch:
        x_p = state
    else:
        x_p = jnp.zeros((batch_p, obs), state.dtype).at[:batch, :].set(state)

    grid = (batch_p // tb,)

    # Input K dim unpadded: block (tb, obs) with obs == full array dim is legal.
    in_specs = [pl.BlockSpec((tb, dims_p[0]), lambda i: (i, 0))]
    flat = []
    for li, (w_p, b_p) in enumerate(padded_params):
        in_p, out_p = dims_p[li], dims_p[li + 1]
        # Constant index_map -> weights/biases stay VMEM-resident across batch tiles.
        # TODO(synk): for wide hidden layers (2k-4k) on v7x (64 MiB VMEM): store
        # weights in bf16, mark these specs pipeline_mode=pl.Buffered(1), set
        # vmem_limit_bytes, or add a K-reduction grid axis with an f32 accumulator.
        in_specs.append(pl.BlockSpec((in_p, out_p), lambda i: (0, 0)))
        in_specs.append(pl.BlockSpec((1, out_p), lambda i: (0, 0)))
        flat.extend([w_p, b_p])
    out_spec = pl.BlockSpec((tb, dims_p[-1]), lambda i: (i, 0))

    kernel = functools.partial(_mlp_kernel, n_layers)
    out_padded = pl.pallas_call(
        kernel,
        out_shape=jax.ShapeDtypeStruct((batch_p, dims_p[-1]), state.dtype),
        grid_spec=pltpu.PrefetchScalarGridSpec(
            num_scalar_prefetch=0,
            grid=grid,
            in_specs=in_specs,
            out_specs=out_spec,
        ),
        compiler_params=pltpu.CompilerParams(
            # Batch tiles are independent -> shard across v7x's two TensorCores
            # (measured no-op on single-TC v5e/v6e, harmless there).
            dimension_semantics=("parallel",),
        ),
    )(x_p, *flat)

    return out_padded[:batch, :out_dim]


def init_dqn_params(key, obs_space, act_space, nr_hiddenlayers, nr_neurons):
    """Mimics the PyTorch __init__: dims = [obs] + nr_neurons + [act].
    Uniform(-1/sqrt(fan_in), 1/sqrt(fan_in)) init (PyTorch default)."""
    dims = [obs_space] + list(nr_neurons) + [act_space]
    assert len(dims) == nr_hiddenlayers + 2
    params = []
    for i in range(nr_hiddenlayers + 1):
        fan_in, fan_out = dims[i], dims[i + 1]
        key, kw, kb = jax.random.split(key, 3)
        bound = 1.0 / (fan_in ** 0.5)
        w = jax.random.uniform(kw, (fan_in, fan_out), jnp.float32, -bound, bound)
        b = jax.random.uniform(kb, (1, fan_out), jnp.float32, -bound, bound)
        params.append((w, b))
    return params


def dqn_reference(state, params):
    x = state
    n = len(params)
    for i, (w, b) in enumerate(params):
        x = x @ w + b
        if i < n - 1:
            x = jnp.maximum(x, 0.0)
    return x


if __name__ == "__main__":
    # DQN: obs_space=16, 2 hidden layers of 32 neurons each, act_space=4, batch=8.
    obs_space, act_space = 16, 4
    nr_hiddenlayers = 2
    nr_neurons = [32, 32]
    batch = 8

    key = jax.random.PRNGKey(0)
    key, k_state = jax.random.split(key)
    state = jax.random.normal(k_state, (batch, obs_space), jnp.float32)

    params = init_dqn_params(key, obs_space, act_space, nr_hiddenlayers, nr_neurons)
    padded_params = pad_dqn_params(params)     # one-time padding (hoisted off the call path)
    num_cores = _num_tensorcores()

    out = dqn_forward(state, padded_params, out_dim=act_space, num_cores=num_cores)
    out = jax.block_until_ready(out)

    ref = dqn_reference(state, params)
    assert out.shape == (batch, act_space)
    assert jnp.allclose(out, ref, atol=1e-4, rtol=1e-4)

    # Also check a batch that is not a sublane multiple (padded-row path).
    small = dqn_forward(state[:3], padded_params, out_dim=act_space, num_cores=num_cores)
    small = jax.block_until_ready(small)
    assert small.shape == (3, act_space)
    assert jnp.allclose(small, ref[:3], atol=1e-4, rtol=1e-4)

    print("KERNEL_OK")
</pallas_src>

<mosaic_0001>
module attributes {stable_mosaic.version = 11 : i64} {
  func.func @_mlp_kernel(%arg0: i32, %arg1: memref<8x16xf32, #tpu.memory_space<vmem>>, %arg2: memref<16x128xf32, #tpu.memory_space<vmem>>, %arg3: memref<1x128xf32, #tpu.memory_space<vmem>>, %arg4: memref<128x128xf32, #tpu.memory_space<vmem>>, %arg5: memref<1x128xf32, #tpu.memory_space<vmem>>, %arg6: memref<128x128xf32, #tpu.memory_space<vmem>>, %arg7: memref<1x128xf32, #tpu.memory_space<vmem>>, %arg8: memref<8x128xf32, #tpu.memory_space<vmem>>) attributes {dimension_semantics = [#tpu.dimension_semantics<parallel>], iteration_bounds = array<i64: 1>, scalar_prefetch = 0 : i64, scratch_operands = 0 : i64, tpu.core_type = #tpu.core_type<tc>, window_params = [{transform_indices = @transform_0, window_bounds = array<i64: 8, 16>}, {pipeline_mode = #tpu.pipeline_mode<synchronous>, transform_indices = @transform_1, window_bounds = array<i64: 16, 128>}, {pipeline_mode = #tpu.pipeline_mode<synchronous>, transform_indices = @transform_2, window_bounds = array<i64: 1, 128>}, {pipeline_mode = #tpu.pipeline_mode<synchronous>, transform_indices = @transform_3, window_bounds = array<i64: 128, 128>}, {pipeline_mode = #tpu.pipeline_mode<synchronous>, transform_indices = @transform_4, window_bounds = array<i64: 1, 128>}, {pipeline_mode = #tpu.pipeline_mode<synchronous>, transform_indices = @transform_5, window_bounds = array<i64: 128, 128>}, {pipeline_mode = #tpu.pipeline_mode<synchronous>, transform_indices = @transform_6, window_bounds = array<i64: 1, 128>}, {transform_indices = @transform_7, window_bounds = array<i64: 8, 128>}]} {
    %c0 = arith.constant 0 : index
    %c0_0 = arith.constant 0 : index
    %0 = vector.load %arg1[%c0, %c0_0] : memref<8x16xf32, #tpu.memory_space<vmem>>, vector<8x16xf32>
    %c0_1 = arith.constant 0 : index
    %c0_2 = arith.constant 0 : index
    %1 = vector.load %arg2[%c0_1, %c0_2] : memref<16x128xf32, #tpu.memory_space<vmem>>, vector<16x128xf32>
    %c0_3 = arith.constant 0 : index
    %c0_4 = arith.constant 0 : index
    %2 = vector.load %arg3[%c0_3, %c0_4] : memref<1x128xf32, #tpu.memory_space<vmem>>, vector<1x128xf32>
    %cst = arith.constant dense<0.000000e+00> : vector<8x128xf32>
    %3 = tpu.matmul %0, %1, %cst {dimension_numbers = #tpu.dot_dimension_numbers<[1], [0], [0], [1], [0, 0, 1, 1], [], []>} : vector<8x16xf32>, vector<16x128xf32>, vector<8x128xf32> -> vector<8x128xf32>
    %4 = vector.broadcast %2 : vector<1x128xf32> to vector<8x128xf32>
    %5 = arith.addf %3, %4 : vector<8x128xf32>
    %cst_5 = arith.constant 0.000000e+00 : f32
    %6 = vector.broadcast %cst_5 : f32 to vector<8x128xf32>
    %7 = arith.maximumf %5, %6 : vector<8x128xf32>
    %c0_6 = arith.constant 0 : index
    %c0_7 = arith.constant 0 : index
    %8 = vector.load %arg4[%c0_6, %c0_7] : memref<128x128xf32, #tpu.memory_space<vmem>>, vector<128x128xf32>
    %c0_8 = arith.constant 0 : index
    %c0_9 = arith.constant 0 : index
    %9 = vector.load %arg5[%c0_8, %c0_9] : memref<1x128xf32, #tpu.memory_space<vmem>>, vector<1x128xf32>
    %cst_10 = arith.constant dense<0.000000e+00> : vector<8x128xf32>
    %10 = tpu.matmul %7, %8, %cst_10 {dimension_numbers = #tpu.dot_dimension_numbers<[1], [0], [0], [1], [0, 0, 1, 1], [], []>} : vector<8x128xf32>, vector<128x128xf32>, vector<8x128xf32> -> vector<8x128xf32>
    %11 = vector.broadcast %9 : vector<1x128xf32> to vector<8x128xf32>
    %12 = arith.addf %10, %11 : vector<8x128xf32>
    %cst_11 = arith.constant 0.000000e+00 : f32
    %13 = vector.broadcast %cst_11 : f32 to vector<8x128xf32>
    %14 = arith.maximumf %12, %13 : vector<8x128xf32>
    %c0_12 = arith.constant 0 : index
    %c0_13 = arith.constant 0 : index
    %15 = vector.load %arg6[%c0_12, %c0_13] : memref<128x128xf32, #tpu.memory_space<vmem>>, vector<128x128xf32>
    %c0_14 = arith.constant 0 : index
    %c0_15 = arith.constant 0 : index
    %16 = vector.load %arg7[%c0_14, %c0_15] : memref<1x128xf32, #tpu.memory_space<vmem>>, vector<1x128xf32>
    %cst_16 = arith.constant dense<0.000000e+00> : vector<8x128xf32>
    %17 = tpu.matmul %14, %15, %cst_16 {dimension_numbers = #tpu.dot_dimension_numbers<[1], [0], [0], [1], [0, 0, 1, 1], [], []>} : vector<8x128xf32>, vector<128x128xf32>, vector<8x128xf32> -> vector<8x128xf32>
    %18 = vector.broadcast %16 : vector<1x128xf32> to vector<8x128xf32>
    %19 = arith.addf %17, %18 : vector<8x128xf32>
    %c0_17 = arith.constant 0 : index
    %c0_18 = arith.constant 0 : index
    %20 = vector.load %arg8[%c0_17, %c0_18] : memref<8x128xf32, #tpu.memory_space<vmem>>, vector<8x128xf32>
    tpu.vector_store %arg8[%c0_17, %c0_18], %19 {strides = array<i32>} : memref<8x128xf32, #tpu.memory_space<vmem>>, vector<8x128xf32>,
    return
  }
  func.func @transform_0(%arg0: i32) -> (i32, i32) {
    %c0_i32 = arith.constant 0 : i32
    %c0_i32_0 = arith.constant 0 : i32
    return %arg0, %c0_i32 : i32, i32
  }
  func.func @transform_1(%arg0: i32) -> (i32, i32) {
    %c0_i32 = arith.constant 0 : i32
    %c0_i32_0 = arith.constant 0 : i32
    %c0_i32_1 = arith.constant 0 : i32
    return %c0_i32, %c0_i32_0 : i32, i32
  }
  func.func @transform_2(%arg0: i32) -> (i32, i32) {
    %c0_i32 = arith.constant 0 : i32
    %c0_i32_0 = arith.constant 0 : i32
    %c0_i32_1 = arith.constant 0 : i32
    return %c0_i32, %c0_i32_0 : i32, i32
  }
  func.func @transform_3(%arg0: i32) -> (i32, i32) {
    %c0_i32 = arith.constant 0 : i32
    %c0_i32_0 = arith.constant 0 : i32
    %c0_i32_1 = arith.constant 0 : i32
    return %c0_i32, %c0_i32_0 : i32, i32
  }
  func.func @transform_4(%arg0: i32) -> (i32, i32) {
    %c0_i32 = arith.constant 0 : i32
    %c0_i32_0 = arith.constant 0 : i32
    %c0_i32_1 = arith.constant 0 : i32
    return %c0_i32, %c0_i32_0 : i32, i32
  }
  func.func @transform_5(%arg0: i32) -> (i32, i32) {
    %c0_i32 = arith.constant 0 : i32
    %c0_i32_0 = arith.constant 0 : i32
    %c0_i32_1 = arith.constant 0 : i32
    return %c0_i32, %c0_i32_0 : i32, i32
  }
  func.func @transform_6(%arg0: i32) -> (i32, i32) {
    %c0_i32 = arith.constant 0 : i32
    %c0_i32_0 = arith.constant 0 : i32
    %c0_i32_1 = arith.constant 0 : i32
    return %c0_i32, %c0_i32_0 : i32, i32
  }
  func.func @transform_7(%arg0: i32) -> (i32, i32) {
    %c0_i32 = arith.constant 0 : i32
    %c0_i32_0 = arith.constant 0 : i32
    return %arg0, %c0_i32 : i32, i32
  }
}

</mosaic_0001>

<bundles_post_ra>
// kernel: dqn_forward.1
= control target key start
LH: loop header
LB: loop body
LE: loop exit
PB: predicated region body
PF: predicated region fallthrough
CT: control target
= control target key end

     0   :  { %12 = vsyncpa [#allocation3], 0  ;;  %s390_s0 = inlined_call_operand.hbm [shape: f32[8,16], index: 0, kind: input, shape index: {}]   ;;  %s391_s1 = inlined_call_operand.hbm [shape: f32[16,128], index: 1, kind: input, shape index: {}]   ;;  %s392_s2 = inlined_call_operand.vmem [shape: f32[1,128], index: 2, kind: input, shape index: {}]   ;;  %s393_s3 = inlined_call_operand.hbm [shape: f32[128,128], index: 3, kind: input, shape index: {}]   ;;  %s394_s4 = inlined_call_operand.vmem [shape: f32[1,128], index: 4, kind: input, shape index: {}]   ;;  %s395_s5 = inlined_call_operand.hbm [shape: f32[128,128], index: 5, kind: input, shape index: {}]   ;;  %s396_s6 = inlined_call_operand.vmem [shape: f32[1,128], index: 6, kind: input, shape index: {}]   ;;  %s397_s7 = inlined_call_operand.vmem [shape: f32[8,128], index: 7, kind: output, shape index: {}]  }
   0x1   :  { %13 = vsyncpa [#allocation5], 0  ;;  %s30_s26 = sshll.u32 %s391_s1, 4  ;;  %s31_s26 = int_to_ptr.hbm [resolvable:$true] %s30_s26 }
   0x2   :  { %14 = vsyncpa [#allocation8], 0  ;;  %s320_s27 = smov [#allocation4]   ;;  %s20_s8 = sshll.u32 %s390_s0, 4  ;;  %s21_s8 = int_to_ptr.hbm [resolvable:$true] %s20_s8 }
   0x3   :  { %s32_s28 = sshll.u32 %s320_s27, 4  ;;  %s321_s9 = smov 128   ;;  %s33_s28 = int_to_ptr.vmem [resolvable:$true] %s32_s28 }
   0x4   :  { %s322_s10 = smov 8   ;;  %s323_s11 = smov [#allocation2]  }
   0x5   :  { %38 = dma.hbm_to_vmem [thread:$0]  %s31_s26, 256, %s33_s28, [#allocation5], %s321_s9, %s321_s9, %s322_s10  }
   0x6   :  { %s22_s12 = sshll.u32 %s323_s11, 4  ;;  %s45_s15 = sshll.u32 %s393_s3, 4  ;;  %s23_s12 = int_to_ptr.vmem [resolvable:$true] %s22_s12  ;;  %s46_s15 = int_to_ptr.hbm [resolvable:$true] %s45_s15 }
   0x7   :  { %25 = dma.hbm_to_vmem [thread:$0]  %s21_s8, 128, %s23_s12, [#allocation3]  }
   0x8   :  { %s60_s17 = sshll.u32 %s395_s5, 4  ;;  %s324_s18 = smov [#allocation6]   ;;  %s61_s17 = int_to_ptr.hbm [resolvable:$true] %s60_s17 }
   0x9   :  { %s47_s19 = sshll.u32 %s324_s18, 4  ;;  %s325_s0 = smov [#allocation7]   ;;  %s48_s19 = int_to_ptr.vmem [resolvable:$true] %s47_s19 }
   0xa   :  { %53 = dma.hbm_to_vmem [thread:$0]  %s46_s15, 2048, %s48_s19, [#allocation5], %s321_s9, %s321_s9, %s322_s10  }
   0xb   :  { %s62_s20 = sshll.u32 %s325_s0, 4  ;;  %s63_s20 = int_to_ptr.vmem [resolvable:$true] %s62_s20 }
   0xc   :  { %68 = dma.hbm_to_vmem [thread:$0]  %s61_s17, 2048, %s63_s20, [#allocation8], %s321_s9, %s321_s9, %s322_s10  }
   0xd   :  { %314 = dma.done.wait [#allocation3], 128  }
   0xe   :  { %315 = vsyncadd [#allocation3], 4294967168 }
   0xf   :  { %316 = dma.done.wait [#allocation5], 2304  }
  0x10   :  { %317 = vsyncadd [#allocation5], 4294964992 }
  0x11   :  { %318 = dma.done.wait [#allocation8], 2048  }
  0x12   :  { %319 = vsyncadd [#allocation8], 4294965248  ;;  %v89_v0 = vld [vmem:[#allocation4 + $0x8] sm:$0xff]  ;;  %v88_v1 = vld [vmem:[#allocation4] sm:$0xff]  ;;  %vm94_vm0 = vcmask 130048  }
  0x13   :  { %112 = vmatpush.msra.mxu0 %v89_v0  ;;  %v87_v2 = vld [vmem:[#allocation2] sm:$0xff]  ;;  %v134_v3 = vld [vmem:[#allocation6 + $0x78] sm:$0xff]  ;;  %v133_v4 = vld [vmem:[#allocation6 + $0x70] sm:$0xff] }
  0x14   :  { %139 = vmatpush.msra.mxu1 %v134_v3  ;;  %v132_v5 = vld [vmem:[#allocation6 + $0x68] sm:$0xff]  ;;  %v131_v6 = vld [vmem:[#allocation6 + $0x60] sm:$0xff]  ;;  %v130_v7 = vld [vmem:[#allocation6 + $0x58] sm:$0xff] }
  0x15   :  { %113 = vmatpush.msra.mxu0 %v88_v1  ;;  %v129_v8 = vld [vmem:[#allocation6 + $0x50] sm:$0xff]  ;;  %v128_v9 = vld [vmem:[#allocation6 + $0x48] sm:$0xff]  ;;  %v127_v10 = vld [vmem:[#allocation6 + $0x40] sm:$0xff] }
  0x16   :  { %208 = vmatmul.msk.f32.vlgmr.msra.gmra.mxu0 %vm94_vm0, %v87_v2  ;;  %140 = vmatpush.msra.mxu1 %v133_v4  ;;  %v126_v11 = vld [vmem:[#allocation6 + $0x38] sm:$0xff]  ;;  %v125_v12 = vld [vmem:[#allocation6 + $0x30] sm:$0xff]  ;;  %v124_v13 = vld [vmem:[#allocation6 + $0x28] sm:$0xff] }
  0x17   :  { %v123_v14 = vld [vmem:[#allocation6 + $0x20] sm:$0xff]  ;;  %v122_v15 = vld [vmem:[#allocation6 + $0x18] sm:$0xff]  ;;  %v121_v16 = vld [vmem:[#allocation6 + $0x10] sm:$0xff] }
  0x18   :  { %141 = vmatpush.msra.mxu1 %v132_v5  ;;  %v120_v17 = vld [vmem:[#allocation6 + $0x8] sm:$0xff]  ;;  %v119_v18 = vld [vmem:[#allocation6] sm:$0xff]  ;;  %v175_v19 = vld [vmem:[#allocation7 + $0x78] sm:$0xff] }
  0x19   :  { %v174_v20 = vld [vmem:[#allocation7 + $0x70] sm:$0xff]  ;;  %180 = vmatpush.msra.mxu2 %v175_v19  ;;  %v173_v21 = vld [vmem:[#allocation7 + $0x68] sm:$0xff]  ;;  %v172_v22 = vld [vmem:[#allocation7 + $0x60] sm:$0xff] }
  0x1a   :  { %142 = vmatpush.msra.mxu1 %v131_v6  ;;  %v171_v23 = vld [vmem:[#allocation7 + $0x58] sm:$0xff]  ;;  %v170_v24 = vld [vmem:[#allocation7 + $0x50] sm:$0xff]  ;;  %v169_v25 = vld [vmem:[#allocation7 + $0x48] sm:$0xff] }
  0x1b   :  { %181 = vmatpush.msra.mxu2 %v174_v20  ;;  %v168_v26 = vld [vmem:[#allocation7 + $0x40] sm:$0xff]  ;;  %v167_v27 = vld [vmem:[#allocation7 + $0x38] sm:$0xff]  ;;  %v166_v28 = vld [vmem:[#allocation7 + $0x30] sm:$0xff] }
  0x1c   :  { %143 = vmatpush.msra.mxu1 %v130_v7  ;;  %v165_v29 = vld [vmem:[#allocation7 + $0x28] sm:$0xff]  ;;  %v164_v30 = vld [vmem:[#allocation7 + $0x20] sm:$0xff]  ;;  %v163_v31 = vld [vmem:[#allocation7 + $0x18] sm:$0xff] }
  0x1d   :  { %182 = vmatpush.msra.mxu2 %v173_v21  ;;  %v215_v32 = vld [vmem:[%s392_s2] ss:$0 sm:$0xff]  ;;  %v162_v36 = vld [vmem:[#allocation7 + $0x10] sm:$0xff]  ;;  %v160_v38 = vld [vmem:[#allocation7] sm:$0xff] }
  0x1e   :  { %144 = vmatpush.msra.mxu1 %v129_v8  ;;  %v161_v37 = vld [vmem:[#allocation7 + $0x8] sm:$0xff] }
  0x1f   :  { %183 = vmatpush.msra.mxu2 %v172_v22  ;;  %v216_v39 = vld [vmem:[%s394_s4] ss:$0 sm:$0xff] }
  0x20   :  { %145 = vmatpush.msra.mxu1 %v128_v9  ;;  %v217_v43 = vld [vmem:[%s396_s6] ss:$0 sm:$0xff] }
  0x21   :  { %184 = vmatpush.msra.mxu2 %v171_v23 }
  0x22   :  { %146 = vmatpush.msra.mxu1 %v127_v10 }
  0x23   :  { %185 = vmatpush.msra.mxu2 %v170_v24 }
  0x24   :  { %147 = vmatpush.msra.mxu1 %v126_v11 }
  0x25   :  { %186 = vmatpush.msra.mxu2 %v169_v25 }
  0x26   :  { %148 = vmatpush.msra.mxu1 %v125_v12 }
  0x27   :  { %187 = vmatpush.msra.mxu2 %v168_v26 }
  0x28   :  { %149 = vmatpush.msra.mxu1 %v124_v13 }
  0x29   :  { %188 = vmatpush.msra.mxu2 %v167_v27 }
  0x2a   :  { %150 = vmatpush.msra.mxu1 %v123_v14 }
  0x2b   :  { %189 = vmatpush.msra.mxu2 %v166_v28 }
  0x2c   :  { %151 = vmatpush.msra.mxu1 %v122_v15 }
  0x2d   :  { %190 = vmatpush.msra.mxu2 %v165_v29 }
  0x2e   :  { %152 = vmatpush.msra.mxu1 %v121_v16 }
  0x2f   :  { %191 = vmatpush.msra.mxu2 %v164_v30 }
  0x30   :  { %153 = vmatpush.msra.mxu1 %v120_v17 }
  0x31   :  { %192 = vmatpush.msra.mxu2 %v163_v31 }
  0x32   :  { %154 = vmatpush.msra.mxu1 %v119_v18 }
  0x33   :  { %193 = vmatpush.msra.mxu2 %v162_v36 }
  0x35   :  { %194 = vmatpush.msra.mxu2 %v161_v37 }
  0x37   :  { %195 = vmatpush.msra.mxu2 %v160_v38 }
  0x93   :  { %v115_v33 = vpop.f32.mrf.mxu0 }
  0x94   :  { %v116_v34 = vadd.f32 %v215_v32, %v115_v33 }
  0x96   :  { %v118_v35 = vmax.f32 %v116_v34, 0.0 }
  0x98   :  { %155 = vmatmul.f32.vlgmr.msra.gmra.mxu1 %v118_v35 }
 0x115   :  { %v156_v40 = vpop.f32.mrf.mxu1 }
 0x116   :  { %v157_v41 = vadd.f32 %v216_v39, %v156_v40 }
 0x118   :  { %v159_v42 = vmax.f32 %v157_v41, 0.0 }
 0x11a   :  { %196 = vmatmul.f32.vlgmr.msra.gmra.mxu2 %v159_v42 }
 0x19d   :  { %v197_v44 = vpop.f32.mrf.mxu2 }
 0x19e   :  { %v198_v45 = vadd.f32 %v217_v43, %v197_v44 }
 0x1a0   :  { %200 = vst [vmem:[%s397_s7] sm:$0xff] %v198_v45 }
 0x1a1   :  { %205 = vsyncpa [#allocation3], 1 }
 0x1a2   :  { %206 = vsyncpa [#allocation5], 1 }
 0x1a3   :  { %207 = vsyncpa [#allocation8], 1 }

</bundles_post_ra>
